<compile_context>
chip_gen: v5e
topology: v5e:2x2
jax: 0.10.0
libtpu: 0.0.40
codegen_flags: <defaults>
</compile_context>

<pallas_src>
import math

import jax
import jax.numpy as jnp
from jax.experimental import pallas as pl
from jax.experimental.pallas import tpu as pltpu

# ---------------------------------------------------------------------------
# Model hyper-parameters (small demo config, shape-consistent with the module)
# ---------------------------------------------------------------------------
INPUT_DIM = 64        # np.cumprod(input_shape)[-1]
HIDDEN_DIMS = 32      # config.hidden_dims (default 800, shrunk for the demo)
NLAYERS = 3           # config.nlayers (default 3)
TARGET_DIM = 16       # np.cumprod(target_shape)[-1]
# target_dist == Normal -> final linear outputs 2 * TARGET_DIM (mu, sigma_raw)

# Lane-padded (layout-only) widths: weights are zero-padded, so the math is
# identical to the unpadded module but every vreg / MXU pass is full width.
LANE = 128
HIDDEN_PAD = max(LANE, ((HIDDEN_DIMS + LANE - 1) // LANE) * LANE)
OUT_PAD = max(LANE, ((2 * TARGET_DIM + LANE - 1) // LANE) * LANE)

ROW_ALIGN = 16        # bf16 sublane packing -> keep row tiles multiples of 16
MAX_TILE = 4096       # ~3.3 MiB of double-buffered IO per step; fits every gen
STD_EPS = 1e-6        # keeps std strictly positive (softplus underflow guard)


def _round_up(a, b):
    return ((a + b - 1) // b) * b


def _silu(x):
    # default vschaos nonlinearity (SiLU): x * sigmoid(x), computed in f32
    return x * jax.lax.logistic(x)


# ---------------------------------------------------------------------------
# Kernel: 3x (Linear + SiLU) -> Linear -> (mu | softplus(sigma)) fused bf16 slab
# ---------------------------------------------------------------------------
def mlp_encoder_kernel(x_ref,
                       w0_ref, b0_ref,
                       w1_ref, b1_ref,
                       w2_ref, b2_ref,
                       wo_ref, bo_ref,
                       out_ref):
    h = x_ref[...]                                                    # bf16 (tile, INPUT_DIM)

    # hidden layer 0: in -> hidden_pad, SiLU (bf16 matmul, f32 accumulate/elementwise)
    a = jnp.dot(h, w0_ref[...], preferred_element_type=jnp.float32) + b0_ref[...]
    h = _silu(a).astype(jnp.bfloat16)
    # hidden layer 1
    a = jnp.dot(h, w1_ref[...], preferred_element_type=jnp.float32) + b1_ref[...]
    h = _silu(a).astype(jnp.bfloat16)
    # hidden layer 2
    a = jnp.dot(h, w2_ref[...], preferred_element_type=jnp.float32) + b2_ref[...]
    h = _silu(a).astype(jnp.bfloat16)

    # output layer (no nonlinearity): single lane-dense 128-wide slab where
    # cols [0, TARGET_DIM) = mu, cols [TARGET_DIM, 2*TARGET_DIM) = sigma_raw.
    raw = jnp.dot(h, wo_ref[...], preferred_element_type=jnp.float32) + bo_ref[...]

    col = jax.lax.broadcasted_iota(jnp.int32, raw.shape, 1)
    is_sigma = (col >= TARGET_DIM) & (col < 2 * TARGET_DIM)
    std = jax.nn.softplus(raw) + STD_EPS       # transcendental -> EUP slot (has slack)
    # bf16 store: halves the dominant HBM writeback stream, stays lane-dense.
    out_ref[...] = jnp.where(is_sigma, std, raw).astype(jnp.bfloat16)


# ---------------------------------------------------------------------------
# Tile selection (adaptive, per review)
# ---------------------------------------------------------------------------
def _choose_tile(n_rows):
    """Pick a row tile that (a) amortizes per-step overhead, (b) keeps padding
    waste low, and (c) yields >=2 grid steps for larger batches so v7x megacore
    actually splits the 'parallel' axis across both TensorCores."""
    if n_rows <= MAX_TILE:
        # Big-enough single batches split in two (both v7x TCs get work);
        # tiny batches stay in one tile (per-step overhead dominates).
        if n_rows >= 2048 and n_rows % (2 * ROW_ALIGN) == 0:
            return n_rows // 2
        return n_rows
    candidates = (512, 1024, 2048, 4096)
    # minimize padded rows, then prefer the bigger tile (fewer grid steps);
    # n_rows > 4096 here, so every candidate already gives >= 2 grid steps.
    return min(candidates, key=lambda t: (_round_up(n_rows, t) - n_rows, -t))


# ---------------------------------------------------------------------------
# Wrapper
# ---------------------------------------------------------------------------
def mlp_encoder_forward(x, params):
    """x: (batch..., INPUT_DIM) -> (mean, std), each (batch..., TARGET_DIM)."""
    batch_shape = x.shape[:-1]
    n = math.prod(batch_shape) if batch_shape else 1
    x2d = x.reshape(n, x.shape[-1])

    # Pad the row count so every tile is full: no masked remainder tiles.
    n16 = _round_up(max(n, 1), ROW_ALIGN)
    tile = _choose_tile(n16)
    n_pad = _round_up(n16, tile)
    if n_pad != n:
        x2d = jnp.pad(x2d, ((0, n_pad - n), (0, 0)))
    x2d = x2d.astype(jnp.bfloat16)   # halves the bandwidth-bound input stream

    w0, b0, w1, b1, w2, b2, wo, bo = params
    grid = (n_pad // tile,)

    # Explicit VMEM budget: resident weights + double-buffered bf16 in/out tiles
    # (guards v5e's 16 MiB scoped default; stays well under v7x's 64 MiB).
    weight_bytes = sum(int(p.size) * p.dtype.itemsize for p in params)
    io_bytes = 2 * tile * (INPUT_DIM * 2 + OUT_PAD * 2)
    vmem_limit = int(min(48 << 20, max(8 << 20, 4 * (weight_bytes + io_bytes))))

    def row_spec(width):
        return pl.BlockSpec((tile, width), lambda i: (i, 0))

    def resident_spec(arr):
        # constant index_map -> weight/bias block stays resident in VMEM
        return pl.BlockSpec(arr.shape, lambda i: (0, 0))

    out = pl.pallas_call(
        mlp_encoder_kernel,
        out_shape=jax.ShapeDtypeStruct((n_pad, OUT_PAD), jnp.bfloat16),
        grid=grid,
        in_specs=[row_spec(INPUT_DIM),
                  resident_spec(w0), resident_spec(b0),
                  resident_spec(w1), resident_spec(b1),
                  resident_spec(w2), resident_spec(b2),
                  resident_spec(wo), resident_spec(bo)],
        out_specs=row_spec(OUT_PAD),
        compiler_params=pltpu.CompilerParams(
            dimension_semantics=("parallel",),        # megacore on v7x
            vmem_limit_bytes=vmem_limit),
    )(x2d, w0, b0, w1, b1, w2, b2, wo, bo)

    # Single narrow slice of the padded slab (one 32-lane contiguous block),
    # then split mean/std from it -- avoids two full-width passes over the
    # 128-wide output outside the kernel.
    slab = out[:n, :2 * TARGET_DIM].astype(jnp.float32)
    mean = slab[:, :TARGET_DIM].reshape(*batch_shape, TARGET_DIM)
    std = slab[:, TARGET_DIM:].reshape(*batch_shape, TARGET_DIM)
    return mean, std


# ---------------------------------------------------------------------------
# Parameters: true-size weights, zero-padded to lane-dense widths, bf16 matmul
# operands, f32 biases.
# ---------------------------------------------------------------------------
def _pad_to(arr, shape):
    pads = [(0, t - s) for s, t in zip(arr.shape, shape)]
    return jnp.pad(arr, pads)


def init_params(key):
    keys = jax.random.split(key, NLAYERS + 1)
    dims_in = [INPUT_DIM] + [HIDDEN_DIMS] * (NLAYERS - 1)
    dims_in_pad = [INPUT_DIM] + [HIDDEN_PAD] * (NLAYERS - 1)

    params = []
    for i in range(NLAYERS):
        fan_in = dims_in[i]
        w = jax.random.normal(keys[i], (dims_in[i], HIDDEN_DIMS), jnp.float32)
        w = w * (1.0 / jnp.sqrt(jnp.float32(fan_in)))
        b = jnp.zeros((HIDDEN_DIMS,), jnp.float32)
        params.append(_pad_to(w, (dims_in_pad[i], HIDDEN_PAD)).astype(jnp.bfloat16))
        params.append(_pad_to(b, (HIDDEN_PAD,)).reshape(1, HIDDEN_PAD))   # f32

    # output layer: hidden -> 2*TARGET_DIM (mu | sigma_raw), zero-padded to 128
    w_out = jax.random.normal(keys[-1], (HIDDEN_DIMS, 2 * TARGET_DIM), jnp.float32)
    w_out = w_out * (1.0 / jnp.sqrt(jnp.float32(HIDDEN_DIMS)))
    b_out = jnp.zeros((2 * TARGET_DIM,), jnp.float32)
    params.append(_pad_to(w_out, (HIDDEN_PAD, OUT_PAD)).astype(jnp.bfloat16))
    params.append(_pad_to(b_out, (OUT_PAD,)).reshape(1, OUT_PAD))         # f32
    return params


# ---------------------------------------------------------------------------
# Pure-JAX reference (same bf16 operand rounding) for a correctness check.
# ---------------------------------------------------------------------------
def _ref_forward(x, params):
    w0, b0, w1, b1, w2, b2, wo, bo = params
    batch_shape = x.shape[:-1]
    h = x.reshape(-1, x.shape[-1]).astype(jnp.bfloat16).astype(jnp.float32)
    for w, b in ((w0, b0), (w1, b1), (w2, b2)):
        h = h @ w.astype(jnp.float32) + b
        h = (h * jax.nn.sigmoid(h)).astype(jnp.bfloat16).astype(jnp.float32)
    raw = h @ wo.astype(jnp.float32) + bo
    mean = raw[:, :TARGET_DIM]
    std = jax.nn.softplus(raw[:, TARGET_DIM:2 * TARGET_DIM]) + STD_EPS
    return (mean.reshape(*batch_shape, TARGET_DIM),
            std.reshape(*batch_shape, TARGET_DIM))


if __name__ == "__main__":
    key = jax.random.PRNGKey(0)
    kx, kp = jax.random.split(key)

    # x: (batch=2, seq=8, input_dim=64); leading dims are batch dims
    # (x.ndim > 2 path: flatten_batch -> MLP -> reshape_batch -> dist).
    x = jax.random.normal(kx, (2, 8, INPUT_DIM), jnp.float32)
    params = init_params(kp)

    mean, std = mlp_encoder_forward(x, params)
    jax.block_until_ready((mean, std))

    assert mean.shape == (2, 8, TARGET_DIM)
    assert std.shape == (2, 8, TARGET_DIM)
    assert bool(jnp.all(std > 0.0))
    assert bool(jnp.all(jnp.isfinite(mean))) and bool(jnp.all(jnp.isfinite(std)))

    mean_ref, std_ref = _ref_forward(x, params)
    assert bool(jnp.allclose(mean, mean_ref, rtol=2e-2, atol=2e-2))
    assert bool(jnp.allclose(std, std_ref, rtol=2e-2, atol=2e-2))

    print("KERNEL_OK")
</pallas_src>

<mosaic_0001>
module attributes {stable_mosaic.version = 11 : i64} {
  func.func @mlp_encoder_kernel(%arg0: i32, %arg1: memref<16x64xbf16, #tpu.memory_space<vmem>>, %arg2: memref<64x128xbf16, #tpu.memory_space<vmem>>, %arg3: memref<1x128xf32, #tpu.memory_space<vmem>>, %arg4: memref<128x128xbf16, #tpu.memory_space<vmem>>, %arg5: memref<1x128xf32, #tpu.memory_space<vmem>>, %arg6: memref<128x128xbf16, #tpu.memory_space<vmem>>, %arg7: memref<1x128xf32, #tpu.memory_space<vmem>>, %arg8: memref<128x128xbf16, #tpu.memory_space<vmem>>, %arg9: memref<1x128xf32, #tpu.memory_space<vmem>>, %arg10: memref<16x128xbf16, #tpu.memory_space<vmem>>) attributes {dimension_semantics = [#tpu.dimension_semantics<parallel>], iteration_bounds = array<i64: 1>, scalar_prefetch = 0 : i64, scratch_operands = 0 : i64, tpu.core_type = #tpu.core_type<tc>, window_params = [{transform_indices = @transform_0, window_bounds = array<i64: 16, 64>}, {pipeline_mode = #tpu.pipeline_mode<synchronous>, transform_indices = @transform_1, window_bounds = array<i64: 64, 128>}, {pipeline_mode = #tpu.pipeline_mode<synchronous>, transform_indices = @transform_2, window_bounds = array<i64: 1, 128>}, {pipeline_mode = #tpu.pipeline_mode<synchronous>, transform_indices = @transform_3, window_bounds = array<i64: 128, 128>}, {pipeline_mode = #tpu.pipeline_mode<synchronous>, transform_indices = @transform_4, window_bounds = array<i64: 1, 128>}, {pipeline_mode = #tpu.pipeline_mode<synchronous>, transform_indices = @transform_5, window_bounds = array<i64: 128, 128>}, {pipeline_mode = #tpu.pipeline_mode<synchronous>, transform_indices = @transform_6, window_bounds = array<i64: 1, 128>}, {pipeline_mode = #tpu.pipeline_mode<synchronous>, transform_indices = @transform_7, window_bounds = array<i64: 128, 128>}, {pipeline_mode = #tpu.pipeline_mode<synchronous>, transform_indices = @transform_8, window_bounds = array<i64: 1, 128>}, {transform_indices = @transform_9, window_bounds = array<i64: 16, 128>}]} {
    %c0 = arith.constant 0 : index
    %c0_0 = arith.constant 0 : index
    %0 = vector.load %arg1[%c0, %c0_0] : memref<16x64xbf16, #tpu.memory_space<vmem>>, vector<16x64xbf16>
    %c0_1 = arith.constant 0 : index
    %c0_2 = arith.constant 0 : index
    %1 = vector.load %arg2[%c0_1, %c0_2] : memref<64x128xbf16, #tpu.memory_space<vmem>>, vector<64x128xbf16>
    %cst = arith.constant dense<0.000000e+00> : vector<16x128xf32>
    %2 = tpu.matmul %0, %1, %cst {dimension_numbers = #tpu.dot_dimension_numbers<[1], [0], [0], [1], [0, 0, 1, 1], [], []>} : vector<16x64xbf16>, vector<64x128xbf16>, vector<16x128xf32> -> vector<16x128xf32>
    %c0_3 = arith.constant 0 : index
    %c0_4 = arith.constant 0 : index
    %3 = vector.load %arg3[%c0_3, %c0_4] : memref<1x128xf32, #tpu.memory_space<vmem>>, vector<1x128xf32>
    %4 = vector.broadcast %3 : vector<1x128xf32> to vector<16x128xf32>
    %5 = arith.addf %2, %4 : vector<16x128xf32>
    %6 = arith.negf %5 : vector<16x128xf32>
    %7 = math.exp %6 : vector<16x128xf32>
    %cst_5 = arith.constant 1.000000e+00 : f32
    %8 = vector.broadcast %cst_5 : f32 to vector<16x128xf32>
    %9 = arith.addf %8, %7 : vector<16x128xf32>
    %10 = arith.divf %8, %9 : vector<16x128xf32>
    %11 = arith.mulf %5, %10 : vector<16x128xf32>
    %12 = arith.truncf %11 : vector<16x128xf32> to vector<16x128xbf16>
    %c0_6 = arith.constant 0 : index
    %c0_7 = arith.constant 0 : index
    %13 = vector.load %arg4[%c0_6, %c0_7] : memref<128x128xbf16, #tpu.memory_space<vmem>>, vector<128x128xbf16>
    %cst_8 = arith.constant dense<0.000000e+00> : vector<16x128xf32>
    %14 = tpu.matmul %12, %13, %cst_8 {dimension_numbers = #tpu.dot_dimension_numbers<[1], [0], [0], [1], [0, 0, 1, 1], [], []>} : vector<16x128xbf16>, vector<128x128xbf16>, vector<16x128xf32> -> vector<16x128xf32>
    %c0_9 = arith.constant 0 : index
    %c0_10 = arith.constant 0 : index
    %15 = vector.load %arg5[%c0_9, %c0_10] : memref<1x128xf32, #tpu.memory_space<vmem>>, vector<1x128xf32>
    %16 = vector.broadcast %15 : vector<1x128xf32> to vector<16x128xf32>
    %17 = arith.addf %14, %16 : vector<16x128xf32>
    %18 = arith.negf %17 : vector<16x128xf32>
    %19 = math.exp %18 : vector<16x128xf32>
    %cst_11 = arith.constant 1.000000e+00 : f32
    %20 = vector.broadcast %cst_11 : f32 to vector<16x128xf32>
    %21 = arith.addf %20, %19 : vector<16x128xf32>
    %22 = arith.divf %20, %21 : vector<16x128xf32>
    %23 = arith.mulf %17, %22 : vector<16x128xf32>
    %24 = arith.truncf %23 : vector<16x128xf32> to vector<16x128xbf16>
    %c0_12 = arith.constant 0 : index
    %c0_13 = arith.constant 0 : index
    %25 = vector.load %arg6[%c0_12, %c0_13] : memref<128x128xbf16, #tpu.memory_space<vmem>>, vector<128x128xbf16>
    %cst_14 = arith.constant dense<0.000000e+00> : vector<16x128xf32>
    %26 = tpu.matmul %24, %25, %cst_14 {dimension_numbers = #tpu.dot_dimension_numbers<[1], [0], [0], [1], [0, 0, 1, 1], [], []>} : vector<16x128xbf16>, vector<128x128xbf16>, vector<16x128xf32> -> vector<16x128xf32>
    %c0_15 = arith.constant 0 : index
    %c0_16 = arith.constant 0 : index
    %27 = vector.load %arg7[%c0_15, %c0_16] : memref<1x128xf32, #tpu.memory_space<vmem>>, vector<1x128xf32>
    %28 = vector.broadcast %27 : vector<1x128xf32> to vector<16x128xf32>
    %29 = arith.addf %26, %28 : vector<16x128xf32>
    %30 = arith.negf %29 : vector<16x128xf32>
    %31 = math.exp %30 : vector<16x128xf32>
    %cst_17 = arith.constant 1.000000e+00 : f32
    %32 = vector.broadcast %cst_17 : f32 to vector<16x128xf32>
    %33 = arith.addf %32, %31 : vector<16x128xf32>
    %34 = arith.divf %32, %33 : vector<16x128xf32>
    %35 = arith.mulf %29, %34 : vector<16x128xf32>
    %36 = arith.truncf %35 : vector<16x128xf32> to vector<16x128xbf16>
    %c0_18 = arith.constant 0 : index
    %c0_19 = arith.constant 0 : index
    %37 = vector.load %arg8[%c0_18, %c0_19] : memref<128x128xbf16, #tpu.memory_space<vmem>>, vector<128x128xbf16>
    %cst_20 = arith.constant dense<0.000000e+00> : vector<16x128xf32>
    %38 = tpu.matmul %36, %37, %cst_20 {dimension_numbers = #tpu.dot_dimension_numbers<[1], [0], [0], [1], [0, 0, 1, 1], [], []>} : vector<16x128xbf16>, vector<128x128xbf16>, vector<16x128xf32> -> vector<16x128xf32>
    %c0_21 = arith.constant 0 : index
    %c0_22 = arith.constant 0 : index
    %39 = vector.load %arg9[%c0_21, %c0_22] : memref<1x128xf32, #tpu.memory_space<vmem>>, vector<1x128xf32>
    %40 = vector.broadcast %39 : vector<1x128xf32> to vector<16x128xf32>
    %41 = arith.addf %38, %40 : vector<16x128xf32>
    %42 = tpu.iota {dimensions = array<i32: 1>} : vector<16x128xi32>
    %c16_i32 = arith.constant 16 : i32
    %43 = vector.broadcast %c16_i32 : i32 to vector<16x128xi32>
    %44 = arith.cmpi sge, %42, %43 : vector<16x128xi32>
    %c32_i32 = arith.constant 32 : i32
    %45 = vector.broadcast %c32_i32 : i32 to vector<16x128xi32>
    %46 = arith.cmpi slt, %42, %45 : vector<16x128xi32>
    %47 = arith.andi %44, %46 : vector<16x128xi1>
    %cst_23 = arith.constant 0.000000e+00 : f32
    %48 = vector.broadcast %cst_23 : f32 to vector<16x128xf32>
    %49 = arith.maximumf %41, %48 : vector<16x128xf32>
    %50 = vector.broadcast %cst_23 : f32 to vector<16x128xf32>
    %51 = arith.subf %41, %50 : vector<16x128xf32>
    %52 = arith.cmpf one, %51, %51 : vector<16x128xf32>
    %53 = vector.broadcast %cst_23 : f32 to vector<16x128xf32>
    %54 = arith.addf %41, %53 : vector<16x128xf32>
    %55 = math.absf %51 : vector<16x128xf32>
    %cst_24 = arith.constant 0.000000e+00 : f32
    %56 = vector.broadcast %cst_24 : f32 to vector<16x128xf32>
    %57 = arith.subf %56, %55 : vector<16x128xf32>
    %58 = math.exp %57 : vector<16x128xf32>
    %59 = math.log1p %58 : vector<16x128xf32>
    %60 = arith.addf %49, %59 : vector<16x128xf32>
    %61 = arith.select %52, %54, %60 : vector<16x128xi1>, vector<16x128xf32>
    %cst_25 = arith.constant 9.99999997E-7 : f32
    %62 = vector.broadcast %cst_25 : f32 to vector<16x128xf32>
    %63 = arith.addf %61, %62 : vector<16x128xf32>
    %64 = arith.select %47, %63, %41 : vector<16x128xi1>, vector<16x128xf32>
    %65 = arith.truncf %64 : vector<16x128xf32> to vector<16x128xbf16>
    %c0_26 = arith.constant 0 : index
    %c0_27 = arith.constant 0 : index
    %66 = vector.load %arg10[%c0_26, %c0_27] : memref<16x128xbf16, #tpu.memory_space<vmem>>, vector<16x128xbf16>
    tpu.vector_store %arg10[%c0_26, %c0_27], %65 {strides = array<i32>} : memref<16x128xbf16, #tpu.memory_space<vmem>>, vector<16x128xbf16>,
    return
  }
  func.func @transform_0(%arg0: i32) -> (i32, i32) {
    %c0_i32 = arith.constant 0 : i32
    %c0_i32_0 = arith.constant 0 : i32
    return %arg0, %c0_i32 : i32, i32
  }
  func.func @transform_1(%arg0: i32) -> (i32, i32) {
    %c0_i32 = arith.constant 0 : i32
    %c0_i32_0 = arith.constant 0 : i32
    %c0_i32_1 = arith.constant 0 : i32
    return %c0_i32, %c0_i32_0 : i32, i32
  }
  func.func @transform_2(%arg0: i32) -> (i32, i32) {
    %c0_i32 = arith.constant 0 : i32
    %c0_i32_0 = arith.constant 0 : i32
    %c0_i32_1 = arith.constant 0 : i32
    return %c0_i32, %c0_i32_0 : i32, i32
  }
  func.func @transform_3(%arg0: i32) -> (i32, i32) {
    %c0_i32 = arith.constant 0 : i32
    %c0_i32_0 = arith.constant 0 : i32
    %c0_i32_1 = arith.constant 0 : i32
    return %c0_i32, %c0_i32_0 : i32, i32
  }
  func.func @transform_4(%arg0: i32) -> (i32, i32) {
    %c0_i32 = arith.constant 0 : i32
    %c0_i32_0 = arith.constant 0 : i32
    %c0_i32_1 = arith.constant 0 : i32
    return %c0_i32, %c0_i32_0 : i32, i32
  }
  func.func @transform_5(%arg0: i32) -> (i32, i32) {
    %c0_i32 = arith.constant 0 : i32
    %c0_i32_0 = arith.constant 0 : i32
    %c0_i32_1 = arith.constant 0 : i32
    return %c0_i32, %c0_i32_0 : i32, i32
  }
  func.func @transform_6(%arg0: i32) -> (i32, i32) {
    %c0_i32 = arith.constant 0 : i32
    %c0_i32_0 = arith.constant 0 : i32
    %c0_i32_1 = arith.constant 0 : i32
    return %c0_i32, %c0_i32_0 : i32, i32
  }
  func.func @transform_7(%arg0: i32) -> (i32, i32) {
    %c0_i32 = arith.constant 0 : i32
    %c0_i32_0 = arith.constant 0 : i32
    %c0_i32_1 = arith.constant 0 : i32
    return %c0_i32, %c0_i32_0 : i32, i32
  }
  func.func @transform_8(%arg0: i32) -> (i32, i32) {
    %c0_i32 = arith.constant 0 : i32
    %c0_i32_0 = arith.constant 0 : i32
    %c0_i32_1 = arith.constant 0 : i32
    return %c0_i32, %c0_i32_0 : i32, i32
  }
  func.func @transform_9(%arg0: i32) -> (i32, i32) {
    %c0_i32 = arith.constant 0 : i32
    %c0_i32_0 = arith.constant 0 : i32
    return %arg0, %c0_i32 : i32, i32
  }
}

</mosaic_0001>

<bundles_post_ra>
// kernel: tpu_custom_call.1
= control target key start
LH: loop header
LB: loop body
LE: loop exit
PB: predicated region body
PF: predicated region fallthrough
CT: control target
= control target key end

     0   :  { %14 = vsyncpa [#allocation3], 0  ;;  %s1071_s0 = inlined_call_operand.hbm [shape: bf16[16,64], index: 0, kind: input, shape index: {}]   ;;  %s1072_s1 = inlined_call_operand.hbm [shape: bf16[64,128], index: 1, kind: input, shape index: {}]   ;;  %s1073_s2 = inlined_call_operand.vmem [shape: f32[1,128], index: 2, kind: input, shape index: {}]   ;;  %s1074_s3 = inlined_call_operand.hbm [shape: bf16[128,128], index: 3, kind: input, shape index: {}]   ;;  %s1075_s4 = inlined_call_operand.vmem [shape: f32[1,128], index: 4, kind: input, shape index: {}]   ;;  %s1076_s5 = inlined_call_operand.hbm [shape: bf16[128,128], index: 5, kind: input, shape index: {}]   ;;  %s1077_s6 = inlined_call_operand.vmem [shape: f32[1,128], index: 6, kind: input, shape index: {}]   ;;  %s1078_s7 = inlined_call_operand.hbm [shape: bf16[128,128], index: 7, kind: input, shape index: {}]   ;;  %s1079_s8 = inlined_call_operand.vmem [shape: f32[1,128], index: 8, kind: input, shape index: {}]   ;;  %s1080_s9 = inlined_call_operand.hbm [shape: bf16[16,128], index: 9, kind: output, shape index: {}]  }
   0x1   :  { %15 = vsyncpa [#allocation6], 0 }
   0x2   :  { %16 = vsyncpa [#allocation9], 0 }
   0x3   :  { %17 = vsyncpa [#allocation4], 0  ;;  %s35_s11 = sshll.u32 %s1072_s1, 4  ;;  %s965_s12 = smov [#allocation5]   ;;  %s36_s11 = int_to_ptr.hbm [resolvable:$true] %s35_s11 }
   0x4   :  { %s37_s13 = sshll.u32 %s965_s12, 4  ;;  %s65_s16 = sshll.u32 %s1076_s5, 4  ;;  %s38_s13 = int_to_ptr.vmem [resolvable:$true] %s37_s13  ;;  %s66_s16 = int_to_ptr.hbm [resolvable:$true] %s65_s16 }
   0x5   :  { %s966_s17 = smov 64   ;;  %s967_s18 = smov 4  }
   0x6   :  { %43 = dma.hbm_to_vmem [thread:$0]  %s36_s11, 512, %s38_s13, [#allocation6], %s966_s17, %s966_s17, %s967_s18  }
   0x7   :  { %s968_s19 = smov [#allocation8]   ;;  %s22_s1 = sshll.u32 %s1071_s0, 4  ;;  %s23_s1 = int_to_ptr.hbm [resolvable:$true] %s22_s1 }
   0x8   :  { %s67_s20 = sshll.u32 %s968_s19, 4  ;;  %s50_s24 = sshll.u32 %s1074_s3, 4  ;;  %s68_s20 = int_to_ptr.vmem [resolvable:$true] %s67_s20  ;;  %s51_s24 = int_to_ptr.hbm [resolvable:$true] %s50_s24 }
   0x9   :  { %73 = dma.hbm_to_vmem [thread:$0]  %s66_s16, 1024, %s68_s20, [#allocation9], %s966_s17, %s966_s17, %s967_s18  }
   0xa   :  { %s969_s25 = smov [#allocation2]   ;;  %s970_s27 = smov [#allocation7]  }
   0xb   :  { %s24_s26 = sshll.u32 %s969_s25, 4  ;;  %s52_s0 = sshll.u32 %s970_s27, 4  ;;  %s25_s26 = int_to_ptr.vmem [resolvable:$true] %s24_s26  ;;  %s53_s0 = int_to_ptr.vmem [resolvable:$true] %s52_s0 }
   0xc   :  { %30 = dma.hbm_to_vmem [thread:$0]  %s23_s1, 128, %s25_s26, [#allocation3], %s966_s17, %s966_s17, %s967_s18  }
   0xd   :  { %s80_s30 = sshll.u32 %s1078_s7, 4  ;;  %s971_s3 = smov [#allocation10]   ;;  %s81_s30 = int_to_ptr.hbm [resolvable:$true] %s80_s30 }
   0xe   :  { %58 = dma.hbm_to_vmem [thread:$0]  %s51_s24, 1024, %s53_s0, [#allocation6], %s966_s17, %s966_s17, %s967_s18  }
   0xf   :  { %s82_s10 = sshll.u32 %s971_s3, 4  ;;  %s83_s10 = int_to_ptr.vmem [resolvable:$true] %s82_s10 }
  0x10   :  { %88 = dma.hbm_to_vmem [thread:$0]  %s81_s30, 1024, %s83_s10, [#allocation9], %s966_s17, %s966_s17, %s967_s18  }
  0x11   :  { %957 = dma.done.wait [#allocation3], 128  }
  0x12   :  { %958 = vsyncadd [#allocation3], 4294967168 }
  0x13   :  { %959 = dma.done.wait [#allocation6], 1536  }
  0x14   :  { %960 = vsyncadd [#allocation6], 4294965760 }
  0x15   :  { %961 = dma.done.wait [#allocation9], 2048  }
  0x16   :  { %962 = vsyncadd [#allocation9], 4294965248  ;;  %v739_v0 = vld [vmem:[#allocation5 + $0x18] sm:$0xff]  ;;  %v738_v1 = vld [vmem:[#allocation5 + $0x10] sm:$0xff]  ;;  %vm155_vm0 = vcmask 523264   ;;  %s597_s20 = sshll.u32 %s1080_s9, 4  ;;  %s598_s20 = int_to_ptr.hbm [resolvable:$true] %s597_s20 }
  0x17   :  { %163 = vmatpush.bf16.msra.mxu0 %v739_v0  ;;  %v737_v2 = vld [vmem:[#allocation5 + $0x8] sm:$0xff]  ;;  %v736_v3 = vld [vmem:[#allocation5] sm:$0xff]  ;;  %v735_v4 = vld [vmem:[#allocation2] sm:$0xff] }
  0x18   :  { %v747_v5 = vld [vmem:[#allocation7 + $0x38] sm:$0xff]  ;;  %v746_v6 = vld [vmem:[#allocation7 + $0x30] sm:$0xff]  ;;  %v745_v7 = vld [vmem:[#allocation7 + $0x28] sm:$0xff] }
  0x19   :  { %282 = vmatpush.bf16.msra.mxu1 %v747_v5  ;;  %v744_v8 = vld [vmem:[#allocation7 + $0x20] sm:$0xff]  ;;  %v743_v9 = vld [vmem:[#allocation7 + $0x18] sm:$0xff]  ;;  %v742_v11 = vld [vmem:[#allocation7 + $0x10] sm:$0xff] }
  0x1a   :  { %v777_v10 = vld [vmem:[%s1073_s2] ss:$0 sm:$0xff]  ;;  %v741_v14 = vld [vmem:[#allocation7 + $0x8] sm:$0xff]  ;;  %v740_v16 = vld [vmem:[#allocation7] sm:$0xff] }
  0x1b   :  { %164 = vmatpush.bf16.msra.mxu0 %v738_v1  ;;  %v755_v47 = vld [vmem:[#allocation8 + $0x38] sm:$0xff]  ;;  %v754_v48 = vld [vmem:[#allocation8 + $0x30] sm:$0xff]  ;;  %v753_v49 = vld [vmem:[#allocation8 + $0x28] sm:$0xff] }
  0x1c   :  { %405 = vmatpush.bf16.msra.mxu2 %v755_v47  ;;  %v752_v50 = vld [vmem:[#allocation8 + $0x20] sm:$0xff]  ;;  %v751_v51 = vld [vmem:[#allocation8 + $0x18] sm:$0xff]  ;;  %v750_v53 = vld [vmem:[#allocation8 + $0x10] sm:$0xff] }
  0x1d   :  { %283 = vmatpush.bf16.msra.mxu1 %v746_v6  ;;  %v778_v52 = vld [vmem:[%s1075_s4] ss:$0 sm:$0xff]  ;;  %v749_v56 = vld [vmem:[#allocation8 + $0x8] sm:$0xff]  ;;  %v748_v58 = vld [vmem:[#allocation8] sm:$0xff] }
  0x1f   :  { %165 = vmatpush.bf16.msra.mxu0 %v737_v2 }
  0x20   :  { %406 = vmatpush.bf16.msra.mxu2 %v754_v48 }
  0x21   :  { %284 = vmatpush.bf16.msra.mxu1 %v745_v7 }
  0x23   :  { %166 = vmatpush.bf16.msra.mxu0 %v736_v3 }
  0x24   :  { %407 = vmatpush.bf16.msra.mxu2 %v753_v49 }
  0x25   :  { %285 = vmatpush.bf16.msra.mxu1 %v744_v8 }
  0x26   :  { %632 = vmatmul.msk.bf16.vlgmr.msra.gmra.mxu0 %vm155_vm0, %v735_v4 }
  0x28   :  { %408 = vmatpush.bf16.msra.mxu2 %v752_v50 }
  0x29   :  { %286 = vmatpush.bf16.msra.mxu1 %v743_v9 }
  0x2c   :  { %409 = vmatpush.bf16.msra.mxu2 %v751_v51 }
  0x2d   :  { %287 = vmatpush.bf16.msra.mxu1 %v742_v11 }
  0x30   :  { %410 = vmatpush.bf16.msra.mxu2 %v750_v53 }
  0x31   :  { %288 = vmatpush.bf16.msra.mxu1 %v741_v14 }
  0x34   :  { %411 = vmatpush.bf16.msra.mxu2 %v749_v56 }
  0x35   :  { %289 = vmatpush.bf16.msra.mxu1 %v740_v16 }
  0x38   :  { %412 = vmatpush.bf16.msra.mxu2 %v748_v58 }
  0xa3   :  { %v168_v12 = vpop.f32.mrf.mxu0 }
  0xa4   :  { %v169_v13 = vadd.f32 %v777_v10, %v168_v12 }
  0xa6   :  { %v633_v15 = vmul.f32 -1.442695, %v169_v13 }
  0xa8   :  { %781 = vpow2.f32 %v633_v15 }
  0xab   :  { %v170_v17 = vpop.f32.mrf.mxu0 }
  0xac   :  { %v171_v18 = vadd.f32 %v777_v10, %v170_v17 }
  0xae   :  { %v782_v19 = vpop.eup %781  ;;  %v634_v20 = vmul.f32 -1.442695, %v171_v18 }
  0xaf   :  { %v179_v21 = vadd.f32 1.0, %v782_v19 }
  0xb0   :  { %783 = vpow2.f32 %v634_v20 }
  0xb1   :  { %785 = vrcp.f32 %v179_v21  ;;  %v192_v31 = vand.u32 2147483648, %v179_v21  ;;  %vm186_vm2 = vweird.f32 %v179_v21  ;;  %v190_v32 = vand.u32 2147483647, %v179_v21 }
  0xb3   :  { %v193_v38 = vor.u32 1.1754944e-38, %v192_v31  ;;  %vm191_vm5 = vcmp.eq.f32.partialorder %v190_v32, 8.507059e+37  ;;  %v758_v31 = vld [vmem:[#allocation10 + $0x10] sm:$0xff] }
  0xb6   :  { %v784_v22 = vpop.eup %783 }
  0xb7   :  { %v786_v23 = vpop.eup %785  ;;  %v180_v24 = vadd.f32 1.0, %v784_v22 }
  0xb8   :  { %v182_v25 = vmul.f32 %v786_v23, %v179_v21  ;;  %vm187_vm1 = vweird.f32 %v786_v23 }
  0xb9   :  { %787 = vrcp.f32 %v180_v24  ;;  %vm188_vm3 = vmor %vm186_vm2, %vm187_vm1  ;;  %v207_v34 = vand.u32 2147483648, %v180_v24  ;;  %v205_v37 = vand.u32 2147483647, %v180_v24  ;;  %vm201_vm6 = vweird.f32 %v180_v24 }
  0xba   :  { %v183_v26 = vsub.f32 1.0, %v182_v25  ;;  %v763_v25 = vld [vmem:[#allocation10 + $0x38] sm:$0xff] }
  0xbb   :  { %v208_v41 = vor.u32 1.1754944e-38, %v207_v34  ;;  %vm206_vm8 = vcmp.eq.f32.partialorder %v205_v37, 8.507059e+37  ;;  %528 = vmatpush.bf16.msra.mxu3 %v763_v25  ;;  %v757_v34 = vld [vmem:[#allocation10 + $0x8] sm:$0xff] }
  0xbc   :  { %v184_v27 = vmul.f32 %v786_v23, %v183_v26  ;;  %v762_v26 = vld [vmem:[#allocation10 + $0x30] sm:$0xff] }
  0xbe   :  { %v185_v29 = vadd.f32 %v786_v23, %v184_v27  ;;  %v761_v27 = vld [vmem:[#allocation10 + $0x28] sm:$0xff] }
  0xbf   :  { %v788_v28 = vpop.eup %787  ;;  %529 = vmatpush.bf16.msra.mxu3 %v762_v26  ;;  %v542_v26 = vlaneseq }
  0xc0   :  { %v197_v30 = vmul.f32 %v788_v28, %v180_v24  ;;  %v189_v35 = vsel %vm188_vm3, %v786_v23, %v185_v29  ;;  %vm202_vm4 = vweird.f32 %v788_v28  ;;  %v759_v29 = vld [vmem:[#allocation10 + $0x18] sm:$0xff] }
  0xc1   :  { %v194_v40 = vsel %vm191_vm5, %v193_v38, %v189_v35  ;;  %vm203_vm7 = vmor %vm201_vm6, %vm202_vm4 }
  0xc2   :  { %v198_v33 = vsub.f32 1.0, %v197_v30  ;;  %v211_v44 = vmul.f32 %v194_v40, %v169_v13  ;;  %v779_v30 = vld [vmem:[%s1077_s6] ss:$0 sm:$0xff] }
  0xc3   :  { %530 = vmatpush.bf16.msra.mxu3 %v761_v27 }
  0xc4   :  { %v199_v36 = vmul.f32 %v788_v28, %v198_v33 }
  0xc6   :  { %v200_v39 = vadd.f32 %v788_v28, %v199_v36  ;;  %v756_v36 = vld [vmem:[#allocation10] sm:$0xff] }
  0xc8   :  { %v204_v42 = vsel %vm203_vm7, %v788_v28, %v200_v39  ;;  %v760_v28 = vld [vmem:[#allocation10 + $0x20] sm:$0xff] }
  0xc9   :  { %v209_v43 = vsel %vm206_vm8, %v208_v41, %v204_v42  ;;  %531 = vmatpush.bf16.msra.mxu3 %v760_v28 }
  0xca   :  { %v212_v45 = vmul.f32 %v209_v43, %v171_v18 }
  0xcc   :  { %v213_v46 = vpack.c.bf16 %v212_v45, %v211_v44 }
  0xcd   :  { %532 = vmatpush.bf16.msra.mxu3 %v759_v29 }
  0xce   :  { %290 = vmatmul.bf16.vlgmr.msra.gmra.mxu1 %v213_v46 }
  0xd1   :  { %533 = vmatpush.bf16.msra.mxu3 %v758_v31  ;;  %v543_v31 = vand.u32 127, %v542_v26 }
  0xd5   :  { %534 = vmatpush.bf16.msra.mxu3 %v757_v34 }
  0xd9   :  { %535 = vmatpush.bf16.msra.mxu3 %v756_v36 }
 0x14b   :  { %v291_v54 = vpop.f32.mrf.mxu1 }
 0x14c   :  { %v292_v55 = vadd.f32 %v778_v52, %v291_v54 }
 0x14e   :  { %v667_v57 = vmul.f32 -1.442695, %v292_v55 }
 0x150   :  { %789 = vpow2.f32 %v667_v57 }
 0x153   :  { %v293_v59 = vpop.f32.mrf.mxu1 }
 0x154   :  { %v294_v60 = vadd.f32 %v778_v52, %v293_v59 }
 0x156   :  { %v790_v61 = vpop.eup %789  ;;  %v668_v62 = vmul.f32 -1.442695, %v294_v60 }
 0x157   :  { %v302_v63 = vadd.f32 1.0, %v790_v61 }
 0x158   :  { %791 = vpow2.f32 %v668_v62 }
 0x159   :  { %793 = vrcp.f32 %v302_v63  ;;  %v315_v9 = vand.u32 2147483648, %v302_v63  ;;  %vm309_vm10 = vweird.f32 %v302_v63  ;;  %v313_v10 = vand.u32 2147483647, %v302_v63 }
 0x15b   :  { %v316_v16 = vor.u32 1.1754944e-38, %v315_v9  ;;  %vm314_vm13 = vcmp.eq.f32.partialorder %v313_v10, 8.507059e+37 }
 0x15e   :  { %v792_v0 = vpop.eup %791 }
 0x15f   :  { %v794_v1 = vpop.eup %793  ;;  %v303_v2 = vadd.f32 1.0, %v792_v0 }
 0x160   :  { %v305_v3 = vmul.f32 %v794_v1, %v302_v63  ;;  %vm310_vm9 = vweird.f32 %v794_v1 }
 0x161   :  { %795 = vrcp.f32 %v303_v2  ;;  %vm311_vm11 = vmor %vm309_vm10, %vm310_vm9  ;;  %v330_v12 = vand.u32 2147483648, %v303_v2  ;;  %v328_v15 = vand.u32 2147483647, %v303_v2  ;;  %vm324_vm14 = vweird.f32 %v303_v2 }
 0x162   :  { %v306_v4 = vsub.f32 1.0, %v305_v3  ;;  %v780_v3 = vld [vmem:[%s1079_s8] ss:$0 sm:$0xff]  ;;  %s972_s8 = smov [#allocation11]  }
 0x163   :  { %v331_v19 = vor.u32 1.1754944e-38, %v330_v12  ;;  %vm329_vm0 = vcmp.eq.f32.partialorder %v328_v15, 8.507059e+37  ;;  %s595_s15 = sshll.u32 %s972_s8, 4  ;;  %s596_s15 = int_to_ptr.vmem [resolvable:$true] %s595_s15 }
 0x164   :  { %v307_v5 = vmul.f32 %v794_v1, %v306_v4 }
 0x166   :  { %v308_v7 = vadd.f32 %v794_v1, %v307_v5 }
 0x167   :  { %v796_v6 = vpop.eup %795 }
 0x168   :  { %v320_v8 = vmul.f32 %v796_v6, %v303_v2  ;;  %v312_v13 = vsel %vm311_vm11, %v794_v1, %v308_v7  ;;  %vm325_vm12 = vweird.f32 %v796_v6 }
 0x169   :  { %v317_v18 = vsel %vm314_vm13, %v316_v16, %v312_v13  ;;  %vm326_vm15 = vmor %vm324_vm14, %vm325_vm12  ;;  %vm544_vm12 = vcmp.ge.s32.totalorder %v543_v31, 16  ;;  %vm545_vm13 = vcmp.lt.s32.totalorder %v543_v31, 32 }
 0x16a   :  { %v321_v11 = vsub.f32 1.0, %v320_v8  ;;  %v334_v22 = vmul.f32 %v317_v18, %v292_v55 }
 0x16c   :  { %v322_v14 = vmul.f32 %v796_v6, %v321_v11 }
 0x16e   :  { %v323_v17 = vadd.f32 %v796_v6, %v322_v14 }
 0x170   :  { %v327_v20 = vsel %vm326_vm15, %v796_v6, %v323_v17  ;;  %vm546_vm15 = vmand %vm544_vm12, %vm545_vm13 }
 0x171   :  { %v332_v21 = vsel %vm329_vm0, %v331_v19, %v327_v20 }
 0x172   :  { %v335_v23 = vmul.f32 %v332_v21, %v294_v60 }
 0x174   :  { %v336_v24 = vpack.c.bf16 %v335_v23, %v334_v22 }
 0x176   :  { %413 = vmatmul.bf16.vlgmr.msra.gmra.mxu2 %v336_v24 }
 0x1f9   :  { %v414_v32 = vpop.f32.mrf.mxu2 }
 0x1fa   :  { %v415_v33 = vadd.f32 %v779_v30, %v414_v32 }
 0x1fc   :  { %v701_v35 = vmul.f32 -1.442695, %v415_v33 }
 0x1fe   :  { %797 = vpow2.f32 %v701_v35 }
 0x201   :  { %v416_v37 = vpop.f32.mrf.mxu2 }
 0x202   :  { %v417_v38 = vadd.f32 %v779_v30, %v416_v37 }
 0x204   :  { %v798_v39 = vpop.eup %797  ;;  %v702_v40 = vmul.f32 -1.442695, %v417_v38 }
 0x205   :  { %v425_v41 = vadd.f32 1.0, %v798_v39 }
 0x206   :  { %799 = vpow2.f32 %v702_v40 }
 0x207   :  { %801 = vrcp.f32 %v425_v41  ;;  %v438_v51 = vand.u32 2147483648, %v425_v41  ;;  %vm432_vm2 = vweird.f32 %v425_v41  ;;  %v436_v52 = vand.u32 2147483647, %v425_v41 }
 0x209   :  { %v439_v58 = vor.u32 1.1754944e-38, %v438_v51  ;;  %vm437_vm5 = vcmp.eq.f32.partialorder %v436_v52, 8.507059e+37 }
 0x20c   :  { %v800_v42 = vpop.eup %799 }
 0x20d   :  { %v802_v43 = vpop.eup %801  ;;  %v426_v44 = vadd.f32 1.0, %v800_v42 }
 0x20e   :  { %v428_v45 = vmul.f32 %v802_v43, %v425_v41  ;;  %vm433_vm1 = vweird.f32 %v802_v43 }
 0x20f   :  { %803 = vrcp.f32 %v426_v44  ;;  %vm434_vm3 = vmor %vm432_vm2, %vm433_vm1  ;;  %v453_v54 = vand.u32 2147483648, %v426_v44  ;;  %v451_v57 = vand.u32 2147483647, %v426_v44  ;;  %vm447_vm6 = vweird.f32 %v426_v44 }
 0x210   :  { %v429_v46 = vsub.f32 1.0, %v428_v45 }
 0x211   :  { %v454_v61 = vor.u32 1.1754944e-38, %v453_v54  ;;  %vm452_vm8 = vcmp.eq.f32.partialorder %v451_v57, 8.507059e+37 }
 0x212   :  { %v430_v47 = vmul.f32 %v802_v43, %v429_v46 }
 0x214   :  { %v431_v49 = vadd.f32 %v802_v43, %v430_v47 }
 0x215   :  { %v804_v48 = vpop.eup %803 }
 0x216   :  { %v443_v50 = vmul.f32 %v804_v48, %v426_v44  ;;  %v435_v55 = vsel %vm434_vm3, %v802_v43, %v431_v49  ;;  %vm448_vm4 = vweird.f32 %v804_v48 }
 0x217   :  { %v440_v60 = vsel %vm437_vm5, %v439_v58, %v435_v55  ;;  %vm449_vm7 = vmor %vm447_vm6, %vm448_vm4 }
 0x218   :  { %v444_v53 = vsub.f32 1.0, %v443_v50  ;;  %v457_v0 = vmul.f32 %v440_v60, %v415_v33 }
 0x21a   :  { %v445_v56 = vmul.f32 %v804_v48, %v444_v53 }
 0x21c   :  { %v446_v59 = vadd.f32 %v804_v48, %v445_v56 }
 0x21e   :  { %v450_v62 = vsel %vm449_vm7, %v804_v48, %v446_v59 }
 0x21f   :  { %v455_v63 = vsel %vm452_vm8, %v454_v61, %v450_v62 }
 0x220   :  { %v458_v1 = vmul.f32 %v455_v63, %v417_v38 }
 0x222   :  { %v459_v2 = vpack.c.bf16 %v458_v1, %v457_v0 }
 0x224   :  { %536 = vmatmul.bf16.vlgmr.msra.gmra.mxu3 %v459_v2 }
 0x2a7   :  { %v537_v4 = vpop.f32.mrf.mxu3 }
 0x2a8   :  { %v538_v5 = vadd.f32 %v780_v3, %v537_v4 }
 0x2aa   :  { %v553_v6 = vand.u32 2147483647, %v538_v5  ;;  %v547_v27 = vmax.f32 %v538_v5, 0.0  ;;  %vm549_vm10 = vcmp.ne.f32.partialorder %v538_v5, %v538_v5 }
 0x2ac   :  { %v555_v7 = vsub.f32 0.0, %v553_v6 }
 0x2ae   :  { %v557_v8 = vmul.f32 1.442695, %v555_v7 }
 0x2af   :  { %v539_v9 = vpop.f32.mrf.mxu3 }
 0x2b0   :  { %805 = vpow2.f32 %v557_v8  ;;  %v540_v10 = vadd.f32 %v780_v3, %v539_v9 }
 0x2b2   :  { %v554_v11 = vand.u32 2147483647, %v540_v10  ;;  %v548_v35 = vmax.f32 %v540_v10, 0.0  ;;  %vm550_vm14 = vcmp.ne.f32.partialorder %v540_v10, %v540_v10 }
 0x2b4   :  { %v556_v12 = vsub.f32 0.0, %v554_v11 }
 0x2b6   :  { %v806_v13 = vpop.eup %805  ;;  %v559_v14 = vmul.f32 1.442695, %v556_v12 }
 0x2b7   :  { %v561_v15 = vadd.f32 1.0, %v806_v13  ;;  %v564_v16 = vmul.f32 -0.5, %v806_v13  ;;  %v567_v18 = vand.u32 2147483647, %v806_v13 }
 0x2b8   :  { %807 = vpow2.f32 %v559_v14 }
 0x2b9   :  { %809 = vlog2.f32 %v561_v15  ;;  %v565_v17 = vadd.f32 1.0, %v564_v16  ;;  %vm568_vm9 = vcmp.lt.f32.partialorder %v567_v18, 0.0004427343 }
 0x2bb   :  { %v566_v23 = vmul.f32 %v806_v13, %v565_v17 }
 0x2be   :  { %v808_v19 = vpop.eup %807 }
 0x2bf   :  { %v810_v20 = vpop.eup %809  ;;  %v570_v21 = vadd.f32 1.0, %v808_v19  ;;  %v573_v24 = vmul.f32 -0.5, %v808_v19  ;;  %v576_v30 = vand.u32 2147483647, %v808_v19 }
 0x2c0   :  { %v563_v22 = vmul.f32 0.6931472, %v810_v20 }
 0x2c1   :  { %811 = vlog2.f32 %v570_v21  ;;  %v574_v28 = vadd.f32 1.0, %v573_v24  ;;  %vm577_vm11 = vcmp.lt.f32.partialorder %v576_v30, 0.0004427343 }
 0x2c2   :  { %v569_v25 = vsel %vm568_vm9, %v566_v23, %v563_v22 }
 0x2c3   :  { %v579_v29 = vadd.f32 %v569_v25, %v547_v27  ;;  %v575_v34 = vmul.f32 %v808_v19, %v574_v28 }
 0x2c5   :  { %v581_v36 = vsel %vm549_vm10, %v538_v5, %v579_v29 }
 0x2c6   :  { %v583_v39 = vadd.f32 1e-06, %v581_v36 }
 0x2c7   :  { %v812_v32 = vpop.eup %811 }
 0x2c8   :  { %v572_v33 = vmul.f32 0.6931472, %v812_v32  ;;  %v585_v42 = vsel %vm546_vm15, %v583_v39, %v538_v5 }
 0x2ca   :  { %v578_v37 = vsel %vm577_vm11, %v575_v34, %v572_v33 }
 0x2cb   :  { %v580_v38 = vadd.f32 %v578_v37, %v548_v35 }
 0x2cd   :  { %v582_v40 = vsel %vm550_vm14, %v540_v10, %v580_v38 }
 0x2ce   :  { %v584_v41 = vadd.f32 1e-06, %v582_v40 }
 0x2d0   :  { %v586_v43 = vsel %vm546_vm15, %v584_v41, %v540_v10 }
 0x2d1   :  { %v767_v44 = vpack.c.bf16 %v586_v43, %v585_v42 }
 0x2d3   :  { %768 = vst [vmem:[#allocation11] sm:$0xff] %v767_v44  }
 0x2d4   :  { %603 = dma.vmem_to_hbm [thread:$0]  %s596_s15, 128, %s598_s20, [#allocation4], %s966_s17, %s966_s17, %s967_s18  }
 0x2d5   :  { %963 = dma.done.wait [#allocation4], 128  }
 0x2d6   :  { %964 = vsyncadd [#allocation4], 4294967168 }
 0x2d7   :  { %608 = vsyncpa [#allocation3], 1 }
 0x2d8   :  { %609 = vsyncpa [#allocation6], 1 }
 0x2d9   :  { %610 = vsyncpa [#allocation9], 1 }
 0x2da   :  { %611 = vsyncpa [#allocation4], 1 }

</bundles_post_ra>
